<compile_context>
chip_gen: v6e
topology: v6e:2x2x1
jax: 0.10.0
libtpu: 0.0.40
codegen_flags: <defaults>
</compile_context>

<pallas_src>
import jax
import jax.numpy as jnp
from jax.experimental import pallas as pl
from jax.experimental.pallas import tpu as pltpu

_MAX_LANES = 1024                        # preferred lane-dense last dim (mult of 128)
_TARGET_BLOCK_BYTES = 4 * 1024 * 1024    # ~4 MiB per buffer per grid step
_MIN_GRID_STEPS = 4                      # aim for >= 4 pipeline steps when rows allow
_VMEM_LIMIT_BYTES = 32 * 1024 * 1024     # fits 4 x 4 MiB double-buffered blocks everywhere


def _round_up(x: int, m: int) -> int:
    return (x + m - 1) // m * m


def _pick_lanes(total: int) -> int:
    """Largest multiple of 128 (<= _MAX_LANES) that divides `total`, else 0."""
    for cand in range(_MAX_LANES, 0, -128):
        if total % cand == 0:
            return cand
    return 0


def _h_sigmoid_kernel(x_ref, o_ref):
    x = x_ref[...]
    # relu6(x + 3) / 6  ==  clamp(x + 3, 0, 6) * (1/6)   (constant mul, no divide)
    o_ref[...] = (jnp.clip(x + 3.0, 0.0, 6.0) * (1.0 / 6.0)).astype(o_ref.dtype)


def h_sigmoid(x: jax.Array) -> jax.Array:
    """Elementwise hard-sigmoid (relu6(x+3)/6) via a tiled Pallas TPU kernel."""
    orig_shape = x.shape
    orig_dtype = x.dtype
    total = x.size
    if total == 0:                       # degenerate empty input
        return x

    itemsize = jnp.dtype(orig_dtype).itemsize
    flat = x.reshape(-1)                 # free (contiguous bitcast)

    lanes = _pick_lanes(total)
    padded_total = total
    if lanes == 0:
        # Fallback only for fully ragged sizes: pad to the next lane multiple.
        lanes = _MAX_LANES
        padded_total = _round_up(total, lanes)
        flat = jnp.pad(flat, (0, padded_total - total))
    rows = padded_total // lanes
    x2d = flat.reshape(rows, lanes)      # free when no padding was needed

    # Row tile: ~_TARGET_BLOCK_BYTES per buffer, multiple of 8, and small
    # enough that the grid has >= _MIN_GRID_STEPS steps for mid-size inputs.
    if rows <= 8:
        tile_rows = rows                 # full extent (tiny tensor, single block)
    else:
        max_tile_rows = max(8, (_TARGET_BLOCK_BYTES // (lanes * itemsize)) // 8 * 8)
        tile_rows = min(max_tile_rows, _round_up(pl.cdiv(rows, _MIN_GRID_STEPS), 8))
    grid = (pl.cdiv(rows, tile_rows),)   # last row-block may be ragged (Pallas clamps it)

    out2d = pl.pallas_call(
        _h_sigmoid_kernel,
        out_shape=jax.ShapeDtypeStruct((rows, lanes), orig_dtype),
        grid=grid,
        in_specs=[pl.BlockSpec((tile_rows, lanes), lambda i: (i, 0))],
        out_specs=pl.BlockSpec((tile_rows, lanes), lambda i: (i, 0)),
        compiler_params=pltpu.CompilerParams(
            dimension_semantics=("parallel",),   # shard row tiles across v7x's 2 TCs
            vmem_limit_bytes=_VMEM_LIMIT_BYTES,
        ),
        cost_estimate=pl.CostEstimate(
            flops=3 * total,
            transcendentals=0,
            bytes_accessed=2 * total * itemsize,
        ),
    )(x2d)

    out_flat = out2d.reshape(-1)
    if padded_total != total:            # only on the ragged fallback path
        out_flat = out_flat[:total]
    return out_flat.reshape(orig_shape)


if __name__ == "__main__":
    def _reference(v):
        return jnp.clip(v + 3.0, 0.0, 6.0) / 6.0

    key = jax.random.PRNGKey(0)
    k1, k2, k3, k4 = jax.random.split(key, 4)

    # Primary: NCHW shape typical of the CoordAtt module (zero-copy, single block).
    x = jax.random.normal(k1, (2, 4, 16, 16), dtype=jnp.float32) * 4.0
    out = h_sigmoid(x)
    jax.block_until_ready(out)
    assert out.shape == x.shape and out.dtype == x.dtype
    assert jnp.allclose(out, _reference(x), atol=1e-6), "mismatch vs reference"

    # Multi-step grid with a ragged last row-block (rows=31, tile=8, grid=4), zero-copy.
    x2 = jax.random.normal(k2, (4, 8, 31, 32), dtype=jnp.float32) * 4.0
    out2 = h_sigmoid(x2)
    jax.block_until_ready(out2)
    assert out2.shape == x2.shape
    assert jnp.allclose(out2, _reference(x2), atol=1e-6), "mismatch vs reference (multi-tile)"

    # Fully ragged total (falls back to lane padding + final slice).
    x3 = jax.random.normal(k3, (2, 3, 7, 7), dtype=jnp.float32) * 4.0
    out3 = h_sigmoid(x3)
    jax.block_until_ready(out3)
    assert out3.shape == x3.shape and out3.dtype == x3.dtype
    assert jnp.allclose(out3, _reference(x3), atol=1e-6), "mismatch vs reference (ragged)"

    # bf16 path (byte-sized tile selection).
    x4 = (jax.random.normal(k4, (2, 4, 16, 16), dtype=jnp.float32) * 4.0).astype(jnp.bfloat16)
    out4 = h_sigmoid(x4)
    jax.block_until_ready(out4)
    assert out4.shape == x4.shape and out4.dtype == jnp.bfloat16
    assert jnp.allclose(out4.astype(jnp.float32),
                        _reference(x4.astype(jnp.float32)), atol=2e-2), "mismatch (bf16)"

    print("KERNEL_OK")
</pallas_src>

<mosaic_0001>
module attributes {stable_mosaic.version = 11 : i64} {
  func.func @_h_sigmoid_kernel(%arg0: i32, %arg1: memref<2x1024xf32, #tpu.memory_space<vmem>>, %arg2: memref<2x1024xf32, #tpu.memory_space<vmem>>) attributes {dimension_semantics = [#tpu.dimension_semantics<parallel>], iteration_bounds = array<i64: 1>, scalar_prefetch = 0 : i64, scratch_operands = 0 : i64, tpu.core_type = #tpu.core_type<tc>, window_params = [{transform_indices = @transform_0, window_bounds = array<i64: 2, 1024>}, {transform_indices = @transform_1, window_bounds = array<i64: 2, 1024>}]} {
    %c0 = arith.constant 0 : index
    %c0_0 = arith.constant 0 : index
    %0 = vector.load %arg1[%c0, %c0_0] : memref<2x1024xf32, #tpu.memory_space<vmem>>, vector<2x1024xf32>
    %cst = arith.constant 3.000000e+00 : f32
    %1 = vector.broadcast %cst : f32 to vector<2x1024xf32>
    %2 = arith.addf %0, %1 : vector<2x1024xf32>
    %cst_1 = arith.constant 0.000000e+00 : f32
    %cst_2 = arith.constant 6.000000e+00 : f32
    %3 = vector.broadcast %cst_1 : f32 to vector<2x1024xf32>
    %4 = arith.maximumf %3, %2 : vector<2x1024xf32>
    %5 = vector.broadcast %cst_2 : f32 to vector<2x1024xf32>
    %6 = arith.minimumf %5, %4 : vector<2x1024xf32>
    %cst_3 = arith.constant 0.166666672 : f32
    %7 = vector.broadcast %cst_3 : f32 to vector<2x1024xf32>
    %8 = arith.mulf %6, %7 : vector<2x1024xf32>
    %c0_4 = arith.constant 0 : index
    %c0_5 = arith.constant 0 : index
    %9 = vector.load %arg2[%c0_4, %c0_5] : memref<2x1024xf32, #tpu.memory_space<vmem>>, vector<2x1024xf32>
    tpu.vector_store %arg2[%c0_4, %c0_5], %8 {strides = array<i32>} : memref<2x1024xf32, #tpu.memory_space<vmem>>, vector<2x1024xf32>,
    return
  }
  func.func @transform_0(%arg0: i32) -> (i32, i32) {
    %c0_i32 = arith.constant 0 : i32
    %c0_i32_0 = arith.constant 0 : i32
    return %arg0, %c0_i32 : i32, i32
  }
  func.func @transform_1(%arg0: i32) -> (i32, i32) {
    %c0_i32 = arith.constant 0 : i32
    %c0_i32_0 = arith.constant 0 : i32
    return %arg0, %c0_i32 : i32, i32
  }
}

</mosaic_0001>

<bundles_post_ra>
// kernel: tpu_custom_call.1
= control target key start
LH: loop header
LB: loop body
LE: loop exit
PB: predicated region body
PF: predicated region fallthrough
CT: control target
= control target key end

     0   :  { %6 = vsyncpa [#allocation3], 0  ;;  %s112_s0 = inlined_call_operand.hbm [shape: f32[2,1024], index: 0, kind: input, shape index: {}]   ;;  %s113_s1 = inlined_call_operand.hbm [shape: f32[2,1024], index: 1, kind: output, shape index: {}]  }
   0x1   :  { %7 = vsyncpa [#allocation4], 0  ;;  %s94_s6 = smov [#allocation2]  }
   0x2   :  { %s14_s7 = sshll.u32 %s94_s6, 4  ;;  %s15_s7 = int_to_ptr.vmem [resolvable:$true] %s14_s7 }
   0x3   :  { %s58_s8 = scalar_lea.vmem %s15_s7, 256  ;;  %p63_p1 = scmp.lt.s32.totalorder %s15_s7, %s15_s7 }
   0x4   :  { %p59_p0 = scmp.ne.s32.totalorder %s15_s7, %s58_s8  ;;  %p64_p2 = scmp.lt.s32.totalorder %s58_s8, %s58_s8 }
   0x6   :  { %p65_p3 = por %p64_p2, %p63_p1 }
   0x8   :  { %p66_p4 = pnand %p65_p3, %p59_p0 }
   0xa   :  { %69 = shalt.err (!%p66_p4)
}
   0xb   :  { %17 = dma.hbm_to_vmem [thread:$0]  %s112_s0, 256, %s15_s7, [#allocation3]  }
   0xc   :  { %90 = dma.done.wait [#allocation3], 256  }
   0xd   :  { %91 = vsyncadd [#allocation3], 4294967040  ;;  %v21_v0 = vld [vmem:[#allocation2] sm:$0xff]  ;;  %v22_v1 = vld [vmem:[#allocation2 + $0x8] sm:$0xff]  ;;  %s95_s11 = smov [#allocation5]  }
   0xe   :  { %v23_v2 = vadd.f32 3.0, %v21_v0  ;;  %v24_v3 = vadd.f32 3.0, %v22_v1  ;;  %s39_s12 = sshll.u32 %s95_s11, 4  ;;  %s40_s12 = int_to_ptr.vmem [resolvable:$true] %s39_s12 }
   0xf   :  { %s70_s13 = scalar_lea.vmem %s40_s12, 256  ;;  %p75_p6 = scmp.lt.s32.totalorder %s40_s12, %s40_s12 }
  0x10   :  { %v25_v4 = vmax.f32 %v23_v2, 0.0  ;;  %v26_v5 = vmax.f32 %v24_v3, 0.0  ;;  %p71_p5 = scmp.ne.s32.totalorder %s40_s12, %s70_s13  ;;  %p76_p7 = scmp.lt.s32.totalorder %s70_s13, %s70_s13 }
  0x12   :  { %v27_v6 = vmin.f32 %v25_v4, 6.0  ;;  %v28_v7 = vmin.f32 %v26_v5, 6.0  ;;  %p77_p8 = por %p76_p7, %p75_p6 }
  0x14   :  { %v29_v8 = vmul.f32 0.16666667, %v27_v6  ;;  %v30_v9 = vmul.f32 0.16666667, %v28_v7  ;;  %p78_p9 = pnand %p77_p8, %p71_p5 }
  0x16   :  { %31 = vst [vmem:[#allocation5] sm:$0xff] %v29_v8  ;;  %32 = vst [vmem:[#allocation5 + $0x8] sm:$0xff] %v30_v9 }
  0x17   :  { %81 = shalt.err (!%p78_p9)
}
  0x18   :  { %42 = dma.vmem_to_hbm [thread:$0]  %s40_s12, 256, %s113_s1, [#allocation4]  }
  0x19   :  { %92 = dma.done.wait [#allocation4], 256  }
  0x1a   :  { %93 = vsyncadd [#allocation4], 4294967040 }
  0x1b   :  { %46 = vsyncpa [#allocation3], 1 }
  0x1c   :  { %47 = vsyncpa [#allocation4], 1 }

</bundles_post_ra>
